<compile_context>
chip_gen: v7x
topology: tpu7x:2x2x1
jax: 0.10.0
libtpu: 0.0.40
codegen_flags: <defaults>
</compile_context>

<pallas_src>
import functools

import jax
import jax.numpy as jnp
from jax import lax
from jax.experimental import pallas as pl
from jax.experimental.pallas import tpu as pltpu


def _conv_bn_relu_kernel(p_ref, w_ref, shift_ref, o_ref, *, H, WC):
    # p_ref:     (1, H, W*K)    im2col'd patch rows for one batch element
    # w_ref:     (W*K, W*Cout)  block-diagonal, BN-scale-folded conv weights
    # shift_ref: (1, W*Cout)    folded BN shift, tiled across W (lane-dense)
    # o_ref:     (1, H, W*Cout)
    y = jnp.dot(p_ref[0], w_ref[...], preferred_element_type=jnp.float32)  # (H, W*Cout)
    y = jnp.maximum(y + shift_ref[...], 0.0)        # BN shift + ReLU on dense (H, 128) tiles
    o_ref[...] = y.reshape(1, H, WC).astype(o_ref.dtype)


def conv_bn_relu(x_nchw, weight_oihw, gamma, beta, run_mean, run_var,
                 *, stride=1, pad=1, bn_eps=1e-5):
    # Only stride=1 / 'same' padding supported (matches the module instantiation).
    assert stride == 1
    N, Cin, H, W = x_nchw.shape
    Cout, Cin_w, KH, KW = weight_oihw.shape
    assert Cin_w == Cin
    assert 2 * pad == KH - 1 and 2 * pad == KW - 1, "pad must give 'same' output"

    K = KH * KW * Cin
    WK = W * K
    WC = W * Cout

    # --- glue (plain JAX, trace-time): layout, padding, im2col, BN folding ---
    x_nhwc = jnp.transpose(x_nchw, (0, 2, 3, 1))                       # N,H,W,Cin
    x_pad = jnp.pad(x_nhwc, ((0, 0), (pad, pad), (pad, pad), (0, 0)))  # N,H+2p,W+2p,Cin

    # im2col: patches[n,h,w, (kh,kw,cin)] = x_pad[n, h+kh, w+kw, cin]
    cols = [x_pad[:, kh:kh + H, kw:kw + W, :] for kh in range(KH) for kw in range(KW)]
    patches = jnp.concatenate(cols, axis=-1)                           # N,H,W,K
    patches = patches.reshape(N, H, WK).astype(jnp.float32)            # N,H,W*K (lane-dense)

    # BN (eval) folding: scale into weights, shift as a lane-dense row.
    scale = (gamma / jnp.sqrt(run_var + bn_eps)).astype(jnp.float32)   # (Cout,)
    shift = (beta - run_mean * scale).astype(jnp.float32)              # (Cout,)
    w_2d = jnp.transpose(weight_oihw, (2, 3, 1, 0)).reshape(K, Cout)   # (K, Cout), (kh,kw,cin) order
    w_scaled = (w_2d * scale[None, :]).astype(jnp.float32)
    # Block-diagonal weight so the matmul output is (H, W*Cout) directly (lane-dense).
    w_big = jnp.kron(jnp.eye(W, dtype=jnp.float32), w_scaled)          # (W*K, W*Cout)
    shift_row = jnp.tile(shift, W).reshape(1, WC)                      # (1, W*Cout)

    kernel = functools.partial(_conv_bn_relu_kernel, H=H, WC=WC)

    out_lane = pl.pallas_call(
        kernel,
        out_shape=jax.ShapeDtypeStruct((N, H, WC), x_nchw.dtype),
        grid_spec=pltpu.PrefetchScalarGridSpec(
            num_scalar_prefetch=0,
            grid=(N,),
            in_specs=[
                pl.BlockSpec((1, H, WK), lambda n: (n, 0, 0)),
                pl.BlockSpec((WK, WC), lambda n: (0, 0)),
                pl.BlockSpec((1, WC), lambda n: (0, 0)),
            ],
            out_specs=pl.BlockSpec((1, H, WC), lambda n: (n, 0, 0)),
        ),
        compiler_params=pltpu.CompilerParams(
            dimension_semantics=("parallel",)),
    )(patches, w_big, shift_row)

    # (N, H, W*Cout) -> (N, H, W, Cout) -> NCHW
    out_nhwc = out_lane.reshape(N, H, W, Cout)
    return jnp.transpose(out_nhwc, (0, 3, 1, 2))


def _reference(x_nchw, weight_oihw, gamma, beta, run_mean, run_var, *, pad=1, bn_eps=1e-5):
    y = lax.conv_general_dilated(
        x_nchw, weight_oihw, window_strides=(1, 1),
        padding=((pad, pad), (pad, pad)),
        dimension_numbers=("NCHW", "OIHW", "NCHW"))
    inv = gamma / jnp.sqrt(run_var + bn_eps)
    y = y * inv[None, :, None, None] + (beta - run_mean * inv)[None, :, None, None]
    return jnp.maximum(y, 0.0)


if __name__ == "__main__":
    # Module config: ConvBnRelu(in_planes=4, out_planes=8, ksize=3, stride=1, pad=1)
    # (has_bn=True, has_relu=True, has_bias=False -> conv has no bias)
    N, Cin, H, W = 2, 4, 16, 16
    Cout, KH, KW = 8, 3, 3

    key = jax.random.PRNGKey(0)
    kx, kw, kg, kb, km, kv = jax.random.split(key, 6)
    x = jax.random.normal(kx, (N, Cin, H, W), dtype=jnp.float32)
    weight = jax.random.normal(kw, (Cout, Cin, KH, KW), dtype=jnp.float32) * 0.1
    gamma = 1.0 + 0.1 * jax.random.normal(kg, (Cout,), dtype=jnp.float32)
    beta = 0.1 * jax.random.normal(kb, (Cout,), dtype=jnp.float32)
    # TODO(synk): BatchNorm2d is evaluated in inference mode (running stats folded
    # into scale/shift); training-mode batch statistics are not computed here.
    run_mean = 0.05 * jax.random.normal(km, (Cout,), dtype=jnp.float32)
    run_var = jnp.abs(1.0 + 0.1 * jax.random.normal(kv, (Cout,), dtype=jnp.float32))

    out = conv_bn_relu(x, weight, gamma, beta, run_mean, run_var, pad=1)
    out = jax.block_until_ready(out)

    ref = _reference(x, weight, gamma, beta, run_mean, run_var, pad=1)
    assert out.shape == (N, Cout, H, W)
    assert jnp.allclose(out, ref, atol=1e-4, rtol=1e-4), "mismatch vs reference"
    print("KERNEL_OK")
</pallas_src>

<mosaic_0001>
module attributes {stable_mosaic.version = 11 : i64} {
  func.func @_conv_bn_relu_kernel(%arg0: i32, %arg1: memref<1x16x576xf32, #tpu.memory_space<vmem>>, %arg2: memref<576x128xf32, #tpu.memory_space<vmem>>, %arg3: memref<1x128xf32, #tpu.memory_space<vmem>>, %arg4: memref<1x16x128xf32, #tpu.memory_space<vmem>>) attributes {dimension_semantics = [#tpu.dimension_semantics<parallel>], iteration_bounds = array<i64: 2>, scalar_prefetch = 0 : i64, scratch_operands = 0 : i64, tpu.core_type = #tpu.core_type<tc>, window_params = [{transform_indices = @transform_0, window_bounds = array<i64: 1, 16, 576>}, {pipeline_mode = #tpu.pipeline_mode<synchronous>, transform_indices = @transform_1, window_bounds = array<i64: 576, 128>}, {pipeline_mode = #tpu.pipeline_mode<synchronous>, transform_indices = @transform_2, window_bounds = array<i64: 1, 128>}, {transform_indices = @transform_3, window_bounds = array<i64: 1, 16, 128>}]} {
    %c0 = arith.constant 0 : index
    %c0_0 = arith.constant 0 : index
    %c0_1 = arith.constant 0 : index
    %0 = vector.load %arg1[%c0, %c0_0, %c0_1] : memref<1x16x576xf32, #tpu.memory_space<vmem>>, vector<1x16x576xf32>
    %1 = vector.shape_cast %0 : vector<1x16x576xf32> to vector<16x576xf32>
    %c0_2 = arith.constant 0 : index
    %c0_3 = arith.constant 0 : index
    %2 = vector.load %arg2[%c0_2, %c0_3] : memref<576x128xf32, #tpu.memory_space<vmem>>, vector<576x128xf32>
    %cst = arith.constant dense<0.000000e+00> : vector<16x128xf32>
    %3 = tpu.matmul %1, %2, %cst {dimension_numbers = #tpu.dot_dimension_numbers<[1], [0], [0], [1], [0, 0, 1, 1], [], []>} : vector<16x576xf32>, vector<576x128xf32>, vector<16x128xf32> -> vector<16x128xf32>
    %c0_4 = arith.constant 0 : index
    %c0_5 = arith.constant 0 : index
    %4 = vector.load %arg3[%c0_4, %c0_5] : memref<1x128xf32, #tpu.memory_space<vmem>>, vector<1x128xf32>
    %5 = vector.broadcast %4 : vector<1x128xf32> to vector<16x128xf32>
    %6 = arith.addf %3, %5 : vector<16x128xf32>
    %cst_6 = arith.constant 0.000000e+00 : f32
    %7 = vector.broadcast %cst_6 : f32 to vector<16x128xf32>
    %8 = arith.maximumf %6, %7 : vector<16x128xf32>
    %9 = vector.shape_cast %8 : vector<16x128xf32> to vector<1x16x128xf32>
    %c0_7 = arith.constant 0 : index
    %c0_8 = arith.constant 0 : index
    %c0_9 = arith.constant 0 : index
    %10 = vector.load %arg4[%c0_7, %c0_8, %c0_9] : memref<1x16x128xf32, #tpu.memory_space<vmem>>, vector<1x16x128xf32>
    tpu.vector_store %arg4[%c0_7, %c0_8, %c0_9], %9 {strides = array<i32>} : memref<1x16x128xf32, #tpu.memory_space<vmem>>, vector<1x16x128xf32>,
    return
  }
  func.func @transform_0(%arg0: i32) -> (i32, i32, i32) {
    %c0_i32 = arith.constant 0 : i32
    %c0_i32_0 = arith.constant 0 : i32
    %c0_i32_1 = arith.constant 0 : i32
    return %arg0, %c0_i32, %c0_i32_0 : i32, i32, i32
  }
  func.func @transform_1(%arg0: i32) -> (i32, i32) {
    %c0_i32 = arith.constant 0 : i32
    %c0_i32_0 = arith.constant 0 : i32
    %c0_i32_1 = arith.constant 0 : i32
    return %c0_i32, %c0_i32_0 : i32, i32
  }
  func.func @transform_2(%arg0: i32) -> (i32, i32) {
    %c0_i32 = arith.constant 0 : i32
    %c0_i32_0 = arith.constant 0 : i32
    %c0_i32_1 = arith.constant 0 : i32
    return %c0_i32, %c0_i32_0 : i32, i32
  }
  func.func @transform_3(%arg0: i32) -> (i32, i32, i32) {
    %c0_i32 = arith.constant 0 : i32
    %c0_i32_0 = arith.constant 0 : i32
    %c0_i32_1 = arith.constant 0 : i32
    return %arg0, %c0_i32, %c0_i32_0 : i32, i32, i32
  }
}

</mosaic_0001>

<bundles_post_ra>
// kernel: tpu_custom_call.1
= control target key start
LH: loop header
LB: loop body
LE: loop exit
PB: predicated region body
PF: predicated region fallthrough
CT: control target
= control target key end

     0   :  { %8 = vsyncpa [#allocation3], 0  ;;  %s1270_s0 = inlined_call_operand.hbm [shape: f32[2,16,576], index: 0, kind: input, shape index: {}]   ;;  %s1271_s1 = inlined_call_operand.hbm [shape: f32[576,128], index: 1, kind: input, shape index: {}]   ;;  %s1272_s2 = inlined_call_operand.vmem [shape: f32[1,128], index: 2, kind: input, shape index: {}]   ;;  %s1273_s3 = inlined_call_operand.hbm [shape: f32[2,16,128], index: 3, kind: output, shape index: {}]  }
   0x1   :  { %10 = vsyncpa [#allocation3 + $0x1], 0 }
   0x2   :  { %11 = vsyncpa [#allocation6], 0 }
   0x3   :  { %12 = vsyncpa [#allocation4], 0 }
   0x4   :  { %14 = vsyncpa [#allocation4 + $0x1], 0  ;;  %s1053_s12 = smov 0   ;;  %s1055_s13 = smov 0  }
   0x5   :  { %s1057_s14 = smov 0   ;;  %s1059_s15 = smov 0  }
   0x6 LB: > { %s1074_s16 = sadd.s32 4294967295, %s1022_s15   ;;  %s626_s17 = sadd.s32 4294967294, %s1022_s15   ;;  %s1022_s15 = sphi %s1059_s15, %s1293_s15   ;;  %s1018_s14 = sphi %s1057_s14, %s1292_s14   ;;  %s1014_s13 = sphi %s1055_s13, %s1291_s13   ;;  %s1010_s12 = sphi %s1053_s12, %s1290_s12  }
   0x7   : > { %p40_p0 = scmp.ne.s32.totalorder %s1014_s13, %s1010_s12  ;;  %p1274_p1 = scmp.eq.s32.totalorder %s1074_s16, 0 }
   0x8   : > { %p112_p3 = scmp.eq.s32.totalorder %s626_s17, 1  ;;  %p627_p5 = scmp.ge.s32.totalorder %s1022_s15, 1 }
   0x9   : > { %p1083_p4 = por %p1274_p1, %p40_p0  ;;  %p119_p7 = scmp.lt.s32.totalorder %s1022_s15, 3 }
   0xa   : > { %p1088_p6 = por %p112_p3, %p40_p0  ;;  %s1024_s21 = smov [#allocation5]  }
   0xb   : > { %s1277_s18 = scalar_select %p1083_p4, 1, 0 }
   0xc   : > { %s1278_s19 = scalar_select %p1088_p6, 1, 0 }
   0xd   : > { %p1093_p8 = pnand %p627_p5, %p119_p7  ;;  %s131_s22 = sshll.u32 %s1024_s21, 4  ;;  %s1097_s22 = int_to_ptr.vmem [resolvable:$true] %s131_s22 }
   0xe   : > { %s1109_s24 = sadd.s32 1, %s1022_s15   ;;  %s27_s25 = sadd.s32 1, %s1018_s14 }
   0xf   : > { %s1279_s20 = scalar_select %p1093_p8, 1, 0 }
  0x10   : > { %p839_p9 = pneg %p1093_p8  ;;  %s24_s26 = ssub.s32 %s1022_s15, %s1109_s24 }
  0x11   : > { %s894_s29 = scalar_lea.hbm %s1271_s1, 9216 }
  0x12   : > { %p1104_p11 = pnand %p839_p9, %p1274_p1  ;;  %p895_p12 = scmp.ne.s32.totalorder %s1271_s1, %s894_s29 }
  0x13   : > { %p901_p5 = scmp.lt.u32.totalorder %s894_s29, %s1271_s1 }
  0x14   : > { %p896_p13 = pneg %p1104_p11 }
  0x16   : > { %p897_p0 = pnand %p896_p13, %p895_p12 }
  0x18   : > { %p898_p3 = pneg %p897_p0 }
  0x1a   : > { %p903_p7 = pnand %p901_p5, %p898_p3 }
  0x1c   : > { %906 = shalt.err (!%p903_p7)
}
  0x1d   : > { %s907_s7 = scalar_lea.vmem %s1097_s22, 9216  ;;  %p915_p2 = scmp.lt.s32.totalorder %s1097_s22, %s1097_s22 }
  0x1e   : > { %p908_p9 = scmp.ne.s32.totalorder %s1097_s22, %s907_s7  ;;  %p916_p6 = scmp.lt.s32.totalorder %s907_s7, %s907_s7 }
  0x20   : > { %p910_p10 = pnand %p908_p9, %p896_p13  ;;  %p917_p4 = por %p916_p6, %p915_p2 }
  0x22   : > { %p911_p1 = pneg %p910_p10 }
  0x24   : > { %p918_p8 = pnand %p917_p4, %p911_p1 }
  0x26   : > { %921 = shalt.err (!%p918_p8)
}
  0x27   : > { %s1025_s8 = smov 128   ;;  %s1026_s9 = smov 8  }
  0x28   : > { %842 = dma.hbm_to_vmem [thread:$0]  (!%p1104_p11), %s1271_s1, 9216, %s1097_s22, [#allocation6], %s1025_s8, %s1025_s8, %s1026_s9  }
  0x29   : > { %p25_p2 = scmp.eq.s32.totalorder %s24_s26, 0  ;;  %p34_p1 = scmp.ne.s32.totalorder %s1018_s14, %s1014_s13 }
  0x2a   : > { %p35_p4 = scmp.eq.s32.totalorder %s1022_s15, 0  ;;  %p852_p6 = scmp.lt.s32.totalorder %s1022_s15, 2 }
  0x2b   : > { %s1140_s17 = scalar_select %p25_p2, %s1018_s14, %s27_s25  }
  0x2c   : > { %p36_p8 = por %p35_p4, %p34_p1  ;;  %p1281_p10 = scmp.eq.s32.totalorder %s1074_s16, 1 }
  0x2d   : > { %s148_s27 = sand.u32 1, %s1018_s14   ;;  %s829_s28 = smul.u32 1280, %s1022_s15 }
  0x2e   : > { %p1144_p12 = por %p1281_p10, %p34_p1  ;;  %s828_s29 = smul.u32 80, %s148_s27 }
  0x2f   : > { %s1153_s4 = scalar_lea.hbm %s1270_s0, %s829_s28  ;;  %p1155_p11 = pnand %p852_p6, %p36_p8 }
  0x30   : > { %s152_s25 = scalar_lea.vmem [#allocation2], %s828_s29  ;;  %s1161_s5 = scalar_lea.sflag [#allocation3], %s148_s27 }
  0x31   : > { %s159_s26 = sshll.u32 %s152_s25, 4  ;;  %s922_s6 = scalar_lea.hbm %s1153_s4, 1280  ;;  %s1159_s26 = int_to_ptr.vmem [resolvable:$true] %s159_s26 }
  0x32   : > { %p923_p13 = scmp.ne.s32.totalorder %s1153_s4, %s922_s6  ;;  %p924_p0 = pneg %p1155_p11 }
  0x33   : > { %s927_s9 = scalar_lea.hbm %s1270_s0, 2560  ;;  %p928_p7 = scmp.lt.u32.totalorder %s1153_s4, %s1270_s0 }
  0x34   : > { %p925_p3 = pnand %p924_p0, %p923_p13  ;;  %p929_p9 = scmp.lt.u32.totalorder %s927_s9, %s922_s6 }
  0x35   : > { %p931_p1 = scmp.lt.u32.totalorder %s922_s6, %s1153_s4 }
  0x36   : > { %p926_p5 = pneg %p925_p3  ;;  %p930_p2 = por %p929_p9, %p928_p7 }
  0x38   : > { %p932_p4 = por %p931_p1, %p930_p2 }
  0x3a   : > { %p933_p6 = pnand %p932_p4, %p926_p5 }
  0x3c   : > { %936 = shalt.err (!%p933_p6)
}
  0x3d   : > { %s937_s27 = scalar_lea.vmem %s1159_s26, 1280  ;;  %s1027_s28 = smov [#allocation2]  }
  0x3e   : > { %p938_p8 = scmp.ne.s32.totalorder %s1159_s26, %s937_s27  ;;  %s942_s29 = sshll.u32 %s1027_s28, 4  ;;  %s943_s29 = int_to_ptr.vmem [resolvable:$false] %s942_s29 }
  0x3f   : > { %s944_s23 = scalar_lea.vmem %s943_s29, 2560  ;;  %p945_p3 = scmp.lt.s32.totalorder %s1159_s26, %s943_s29 }
  0x40   : > { %p940_p10 = pnand %p938_p8, %p924_p0  ;;  %p946_p7 = scmp.lt.s32.totalorder %s944_s23, %s937_s27 }
  0x42   : > { %p941_p13 = pneg %p940_p10  ;;  %p947_p9 = por %p946_p7, %p945_p3 }
  0x44   : > { %p948_p2 = pnand %p947_p9, %p941_p13 }
  0x46   : > { %951 = shalt.err (!%p948_p2)
}
  0x47   : > { %s1028_s30 = smov 640   ;;  %s1029_s25 = smov 40  }
  0x48   : > { %846 = dma.hbm_to_vmem [thread:$0]  (!%p1155_p11), %s1153_s4, 1280, %s1159_s26, %s1161_s5, %s1028_s30, %s1028_s30, %s1029_s25  }
  0x49   : > { %p1284_p0 = scmp.ne.s32.totalorder %s1279_s20, 0 }
  0x4a   : > { %s1192_s6 = sand.u32 (!%p1284_p0), 1, %s1014_s13   ;;  %p1285_p5 = scmp.ne.s32.totalorder (!%p1284_p0), %s1277_s18, 0 }
  0x4b   : > { %171 = sbr.rel (%p1284_p0) target bundleno = 369 (0x171), region = 32  ;;  %s174_s8 = scalar_lea.sflag (!%p1284_p0), [#allocation3], %s1192_s6 }
  0x4c   : > { %s830_s7 = smul.u32 (!%p1284_p0), 80, %s1192_s6 }
  0x4e   : > { %s1196_s9 = scalar_lea.vmem (!%p1284_p0), [#allocation2], %s830_s7 }
  0x52   : > { %997 = dma.done.wait (%p1285_p5), %s174_s8, 1280  }
  0x53   : > { %999 = vsyncadd (%p1285_p5), %s174_s8, 4294966016  ;;  %p1286_p11 = scmp.eq.s32.totalorder %s1074_s16, 0 }
  0x55   : > { %1001 = dma.done.wait (%p1286_p11), [#allocation6], 9216   ;;  %p1287_p1 = pmov %p1286_p11 }
  0x56   : > { %v230_v0 = vld [vmem:[#allocation5 + $0x80] sm:$0xff]  ;;  %v231_v1 = vld [vmem:[#allocation5 + $0x88] sm:$0xff]  ;;  %v232_v11 = vld [vmem:[#allocation5 + $0x90] sm:$0xff]  ;;  %vm293_vm0 = vcmask 523264   ;;  %s633_s4 = sshll.u32 %s1192_s6, 4  ;;  %s642_s5 = sshll.u32 %s1074_s16, 8 }
  0x57   : > { %1003 = vsyncadd (%p1287_p1), [#allocation6], 4294958080  ;;  %v214_v2 = vld [vmem:[#allocation5] sm:$0xff]  ;;  %v748_v3 = vpack.c.bf16 %v231_v1, %v230_v0  ;;  %v215_v4 = vld [vmem:[#allocation5 + $0x8] sm:$0xff]  ;;  %s203_s22 = scalar_lea.vmem [#allocation7], %s633_s4  ;;  %s1226_s27 = scalar_lea.hbm %s1273_s3, %s642_s5 }
  0x58   : > { %v262_v5 = vld [vmem:[#allocation5 + $0x180] sm:$0xff]  ;;  %v263_v6 = vld [vmem:[#allocation5 + $0x188] sm:$0xff]  ;;  %v750_v7 = vpack.c.bf16 %v215_v4, %v214_v2  ;;  %v233_v13 = vld [vmem:[#allocation5 + $0x98] sm:$0xff]  ;;  %s543_s26 = sshll.u32 %s203_s22, 4  ;;  %s530_s28 = scalar_lea.sflag [#allocation4], %s1192_s6  ;;  %s1221_s26 = int_to_ptr.vmem [resolvable:$true] %s543_s26 }
  0x59   : > { %v780_v8 = vpack.c.bf16 %v263_v6, %v262_v5  ;;  %v246_v9 = vld [vmem:[#allocation5 + $0x100] sm:$0xff]  ;;  %v247_v10 = vld [vmem:[#allocation5 + $0x108] sm:$0xff]  ;;  %749 = vmatprep.subr.bf16.mxu0 %v748_v3  ;;  %v216_v14 = vld [vmem:[#allocation5 + $0x10] sm:$0xff]  ;;  %v752_v16 = vpack.c.bf16 %v233_v13, %v232_v11  ;;  %s952_s29 = scalar_lea.vmem %s1221_s26, 256  ;;  %s1030_s16 = smov [#allocation7]  }
  0x5a   : > { %v782_v12 = vpack.c.bf16 %v247_v10, %v246_v9  ;;  %v217_v15 = vld [vmem:[#allocation5 + $0x18] sm:$0xff]  ;;  %751 = vmatpush3.bf16.msra.mxu0 %v750_v7  ;;  %v264_v18 = vld [vmem:[#allocation5 + $0x190] sm:$0xff]  ;;  %v234_v23 = vld [vmem:[#allocation5 + $0xa0] sm:$0xff]  ;;  %p953_p4 = scmp.ne.s32.totalorder %s1221_s26, %s952_s29  ;;  %s956_s23 = sshll.u32 %s1030_s16, 4  ;;  %s957_s23 = int_to_ptr.vmem [resolvable:$false] %s956_s23 }
  0x5b   : > { %781 = vmatprep.subr.bf16.mxu1 %v780_v8  ;;  %v754_v17 = vpack.c.bf16 %v217_v15, %v216_v14  ;;  %v265_v19 = vld [vmem:[#allocation5 + $0x198] sm:$0xff]  ;;  %v248_v20 = vld [vmem:[#allocation5 + $0x110] sm:$0xff]  ;;  %v235_v24 = vld [vmem:[#allocation5 + $0xa8] sm:$0xff]  ;;  %753 = vmatprep.subr.bf16.mxu0 %v752_v16  ;;  %s958_s30 = scalar_lea.vmem %s957_s23, 512  ;;  %p959_p10 = scmp.lt.s32.totalorder %s1221_s26, %s957_s23 }
  0x5c   : > { %783 = vmatpush3.bf16.msra.mxu1 %v782_v12  ;;  %v784_v21 = vpack.c.bf16 %v265_v19, %v264_v18  ;;  %v249_v22 = vld [vmem:[#allocation5 + $0x118] sm:$0xff]  ;;  %v756_v26 = vpack.c.bf16 %v235_v24, %v234_v23  ;;  %v218_v27 = vld [vmem:[#allocation5 + $0x20] sm:$0xff]  ;;  %v219_v28 = vld [vmem:[#allocation5 + $0x28] sm:$0xff]  ;;  %p954_p6 = pnand %p953_p4, %p1144_p12  ;;  %p960_p13 = scmp.lt.s32.totalorder %s958_s30, %s952_s29 }
  0x5d   : > { %v786_v25 = vpack.c.bf16 %v249_v22, %v248_v20  ;;  %v266_v29 = vld [vmem:[#allocation5 + $0x1a0] sm:$0xff]  ;;  %v267_v30 = vld [vmem:[#allocation5 + $0x1a8] sm:$0xff]  ;;  %v758_v33 = vpack.c.bf16 %v219_v28, %v218_v27  ;;  %v236_v35 = vld [vmem:[#allocation5 + $0xb0] sm:$0xff] }
  0x5e   : > { %785 = vmatprep.subr.bf16.mxu1 %v784_v21  ;;  %v250_v31 = vld [vmem:[#allocation5 + $0x120] sm:$0xff]  ;;  %v251_v32 = vld [vmem:[#allocation5 + $0x128] sm:$0xff]  ;;  %755 = vmatpush3.bf16.msra.mxu0 %v754_v17  ;;  %v788_v34 = vpack.c.bf16 %v267_v30, %v266_v29  ;;  %v237_v36 = vld [vmem:[#allocation5 + $0xb8] sm:$0xff]  ;;  %p955_p8 = pneg %p954_p6  ;;  %p961_p3 = por %p960_p13, %p959_p10 }
  0x5f   : > { %v220_v37 = vld [vmem:[#allocation5 + $0x30] sm:$0xff]  ;;  %757 = vmatprep.subr.bf16.mxu0 %v756_v26  ;;  %v790_v38 = vpack.c.bf16 %v251_v32, %v250_v31  ;;  %v760_v39 = vpack.c.bf16 %v237_v36, %v236_v35  ;;  %v221_v40 = vld [vmem:[#allocation5 + $0x38] sm:$0xff]  ;;  %v238_v46 = vld [vmem:[#allocation5 + $0xc0] sm:$0xff] }
  0x60   : > { %787 = vmatpush3.bf16.msra.mxu1 %v786_v25  ;;  %v268_v41 = vld [vmem:[#allocation5 + $0x1b0] sm:$0xff]  ;;  %v269_v42 = vld [vmem:[#allocation5 + $0x1b8] sm:$0xff]  ;;  %v239_v47 = vld [vmem:[#allocation5 + $0xc8] sm:$0xff]  ;;  %v762_v48 = vpack.c.bf16 %v221_v40, %v220_v37  ;;  %p962_p7 = pnand %p961_p3, %p955_p8 }
  0x61   : > { %789 = vmatprep.subr.bf16.mxu1 %v788_v34  ;;  %v792_v43 = vpack.c.bf16 %v269_v42, %v268_v41  ;;  %v252_v44 = vld [vmem:[#allocation5 + $0x130] sm:$0xff]  ;;  %v253_v45 = vld [vmem:[#allocation5 + $0x138] sm:$0xff]  ;;  %v270_v49 = vld [vmem:[#allocation5 + $0x1c0] sm:$0xff]  ;;  %v764_v52 = vpack.c.bf16 %v239_v47, %v238_v46 }
  0x62   : > { %759 = vmatpush3.bf16.msra.mxu0 %v758_v33  ;;  %v271_v50 = vld [vmem:[#allocation5 + $0x1c8] sm:$0xff]  ;;  %v794_v51 = vpack.c.bf16 %v253_v45, %v252_v44  ;;  %v222_v53 = vld [vmem:[#allocation5 + $0x40] sm:$0xff]  ;;  %v240_v58 = vld [vmem:[#allocation5 + $0xd0] sm:$0xff] }
  0x63   : > { %761 = vmatprep.subr.bf16.mxu0 %v760_v39  ;;  %v223_v54 = vld [vmem:[#allocation5 + $0x48] sm:$0xff]  ;;  %v254_v55 = vld [vmem:[#allocation5 + $0x140] sm:$0xff]  ;;  %v796_v56 = vpack.c.bf16 %v271_v50, %v270_v49  ;;  %v241_v59 = vld [vmem:[#allocation5 + $0xd8] sm:$0xff] }
  0x64   : > { %791 = vmatpush3.bf16.msra.mxu1 %v790_v38  ;;  %v255_v57 = vld [vmem:[#allocation5 + $0x148] sm:$0xff]  ;;  %v272_v60 = vld [vmem:[#allocation5 + $0x1d0] sm:$0xff]  ;;  %v273_v61 = vld [vmem:[#allocation5 + $0x1d8] sm:$0xff]  ;;  %v766_v62 = vpack.c.bf16 %v223_v54, %v222_v53  ;;  %v768_v0 = vpack.c.bf16 %v241_v59, %v240_v58 }
  0x65   : > { %793 = vmatprep.subr.bf16.mxu1 %v792_v43  ;;  %v798_v63 = vpack.c.bf16 %v255_v57, %v254_v55  ;;  %v224_v1 = vld [vmem:[#allocation5 + $0x50] sm:$0xff]  ;;  %v225_v2 = vld [vmem:[#allocation5 + $0x58] sm:$0xff]  ;;  %v800_v4 = vpack.c.bf16 %v273_v61, %v272_v60  ;;  %v242_v6 = vld [vmem:[#allocation5 + $0xe0] sm:$0xff] }
  0x66   : > { %763 = vmatpush3.bf16.msra.mxu0 %v762_v48  ;;  %v256_v3 = vld [vmem:[#allocation5 + $0x150] sm:$0xff]  ;;  %v257_v5 = vld [vmem:[#allocation5 + $0x158] sm:$0xff]  ;;  %v243_v7 = vld [vmem:[#allocation5 + $0xe8] sm:$0xff]  ;;  %v770_v10 = vpack.c.bf16 %v225_v2, %v224_v1 }
  0x67   : > { %765 = vmatprep.subr.bf16.mxu0 %v764_v52  ;;  %v274_v8 = vld [vmem:[#allocation5 + $0x1e0] sm:$0xff]  ;;  %v275_v9 = vld [vmem:[#allocation5 + $0x1e8] sm:$0xff]  ;;  %v802_v13 = vpack.c.bf16 %v257_v5, %v256_v3  ;;  %v772_v14 = vpack.c.bf16 %v243_v7, %v242_v6  ;;  %v244_v19 = vld [vmem:[#allocation5 + $0xf0] sm:$0xff] }
  0x68   : > { %795 = vmatpush3.bf16.msra.mxu1 %v794_v51  ;;  %v226_v11 = vld [vmem:[#allocation5 + $0x60] sm:$0xff]  ;;  %v205_v12 = vld [vmem:[%s1196_s9 + $0x8] sm:$0xff]  ;;  %v804_v18 = vpack.c.bf16 %v275_v9, %v274_v8  ;;  %v207_v21 = vld [vmem:[%s1196_s9 + $0x18] sm:$0xff] }
  0x69   : > { %797 = vmatprep.subr.bf16.mxu1 %v796_v56  ;;  %v227_v15 = vld [vmem:[#allocation5 + $0x68] sm:$0xff]  ;;  %v258_v16 = vld [vmem:[#allocation5 + $0x160] sm:$0xff]  ;;  %v245_v20 = vld [vmem:[#allocation5 + $0xf8] sm:$0xff]  ;;  %364 = vmatprep.mubr.f32.mxu0 %v205_v12 }
  0x6a   : > { %767 = vmatpush3.bf16.msra.mxu0 %v766_v62  ;;  %v259_v17 = vld [vmem:[#allocation5 + $0x168] sm:$0xff]  ;;  %v276_v22 = vld [vmem:[#allocation5 + $0x1f0] sm:$0xff]  ;;  %v277_v23 = vld [vmem:[#allocation5 + $0x1f8] sm:$0xff]  ;;  %439 = vmatprep.mubr.f32.mxu1 %v207_v21  ;;  %v774_v24 = vpack.c.bf16 %v227_v15, %v226_v11  ;;  %v776_v26 = vpack.c.bf16 %v245_v20, %v244_v19 }
  0x6b   : > { %769 = vmatprep.subr.bf16.mxu0 %v768_v0  ;;  %v806_v25 = vpack.c.bf16 %v259_v17, %v258_v16  ;;  %v228_v27 = vld [vmem:[#allocation5 + $0x70] sm:$0xff]  ;;  %v229_v28 = vld [vmem:[#allocation5 + $0x78] sm:$0xff]  ;;  %v808_v30 = vpack.c.bf16 %v277_v23, %v276_v22  ;;  %v278_v32 = vld [vmem:[#allocation5 + $0x200] sm:$0xff] }
  0x6c   : > { %799 = vmatpush3.bf16.msra.mxu1 %v798_v63  ;;  %v260_v29 = vld [vmem:[#allocation5 + $0x170] sm:$0xff]  ;;  %v261_v31 = vld [vmem:[#allocation5 + $0x178] sm:$0xff]  ;;  %v279_v33 = vld [vmem:[#allocation5 + $0x208] sm:$0xff]  ;;  %v778_v34 = vpack.c.bf16 %v229_v28, %v228_v27 }
  0x6d   : > { %801 = vmatprep.subr.bf16.mxu1 %v800_v4  ;;  %v810_v35 = vpack.c.bf16 %v261_v31, %v260_v29  ;;  %v812_v36 = vpack.c.bf16 %v279_v33, %v278_v32  ;;  %v280_v37 = vld [vmem:[#allocation5 + $0x210] sm:$0xff]  ;;  %v281_v38 = vld [vmem:[#allocation5 + $0x218] sm:$0xff]  ;;  %v282_v43 = vld [vmem:[#allocation5 + $0x220] sm:$0xff] }
  0x6e   : > { %771 = vmatpush3.bf16.msra.mxu0 %v770_v10  ;;  %v204_v39 = vld [vmem:[%s1196_s9] sm:$0xff]  ;;  %v206_v40 = vld [vmem:[%s1196_s9 + $0x10] sm:$0xff]  ;;  %v816_v41 = vpack.c.bf16 %v281_v38, %v280_v37  ;;  %v283_v44 = vld [vmem:[#allocation5 + $0x228] sm:$0xff] }
  0x6f   : > { %773 = vmatprep.subr.bf16.mxu0 %v772_v14  ;;  %v210_v42 = vld [vmem:[%s1196_s9 + $0x30] sm:$0xff]  ;;  %v212_v45 = vld [vmem:[%s1196_s9 + $0x40] sm:$0xff]  ;;  %v209_v46 = vld [vmem:[%s1196_s9 + $0x28] sm:$0xff]  ;;  %v820_v47 = vpack.c.bf16 %v283_v44, %v282_v43 }
  0x70   : > { %803 = vmatpush3.bf16.msra.mxu1 %v802_v13  ;;  %v211_v48 = vld [vmem:[%s1196_s9 + $0x38] sm:$0xff]  ;;  %v284_v49 = vld [vmem:[#allocation5 + $0x230] sm:$0xff]  ;;  %v213_v53 = vld [vmem:[%s1196_s9 + $0x48] sm:$0xff] }
  0x71   : > { %805 = vmatprep.subr.bf16.mxu1 %v804_v18  ;;  %v285_v50 = vld [vmem:[#allocation5 + $0x238] sm:$0xff]  ;;  %v208_v51 = vld [vmem:[%s1196_s9 + $0x20] sm:$0xff] }
  0x72   : > { %775 = vmatpush3.bf16.msra.mxu0 %v774_v24  ;;  %v824_v52 = vpack.c.bf16 %v285_v50, %v284_v49  ;;  %v634_v55 = vld [vmem:[%s1272_s2] ss:$0 sm:$0xff] }
  0x73   : > { %777 = vmatprep.subr.bf16.mxu0 %v776_v26 }
  0x74   : > { %807 = vmatpush3.bf16.msra.mxu1 %v806_v25 }
  0x75   : > { %809 = vmatprep.subr.bf16.mxu1 %v808_v30 }
  0x76   : > { %779 = vmatpush3.bf16.msra.mxu0 %v778_v34 }
  0x77   : > { %813 = vmatprep.subr.bf16.mxu0 %v812_v36 }
  0x78   : > { %811 = vmatpush3.bf16.msra.mxu1 %v810_v35 }
  0x79   : > { %365 = vmatmul.mubr.f32.vlgmr.msra.gmra.mrb[0].mxu0 %v204_v39 }
  0x7a   : > { %815 = vmatpush3.bf16.msra.mxu0 %v812_v36  ;;  %369 = vmatprep.mubr.f32.mxu0 %v210_v42 }
  0x7b   : > { %440 = vmatmul.mubr.f32.vlgmr.msra.gmra.mrb[0].mxu1 %v206_v40  ;;  %817 = vmatprep.subr.bf16.mxu0 %v816_v41 }
  0x7c   : > { %444 = vmatprep.mubr.f32.mxu1 %v212_v45 }
  0x7d   : > { %370 = vmatmul.mubr.f32.gmra.mrb[2].mxu0 %v209_v46 }
  0x7e   : > { %819 = vmatpush3.bf16.msra.mxu0 %v816_v41  ;;  %745 = vmatprep.mubr.msk.f32.mxu0 %vm293_vm0, %v208_v51 }
  0x7f   : > { %445 = vmatmul.mubr.f32.gmra.mrb[2].mxu1 %v211_v48  ;;  %821 = vmatprep.subr.bf16.mxu0 %v820_v47 }
  0x82   : > { %823 = vmatpush3.bf16.msra.mxu0 %v820_v47 }
  0x83   : > { %825 = vmatprep.subr.bf16.mxu0 %v824_v52 }
  0x86   : > { %827 = vmatpush3.bf16.msra.mxu0 %v824_v52 }
  0x89   : > { %746 = vmatmul.mubr.msk.f32.vlgmr.msra.gmra.mrb[4].mxu0 %vm293_vm0, %v213_v53 }
 0x14c   : > { %v675_v54 = vpop.f32.mrb[0].mxu0 }
 0x14d   : > { %v676_v56 = vpop.f32.mrb[1].mxu0 }
 0x14e   : > { %v713_v57 = vpop.f32.mrb[0].mxu1  ;;  %v677_v58 = vadd.f32 %v676_v56, %v675_v54 }
 0x14f   : > { %v714_v59 = vpop.f32.mrb[1].mxu1 }
 0x150   : > { %v715_v60 = vadd.f32 %v714_v59, %v713_v57  ;;  %v367_v61 = vadd.f32 %v677_v58, %v634_v55  ;;  %v678_v62 = vpop.f32.mrb[2].mxu0 }
 0x151   : > { %v679_v63 = vpop.f32.mrb[3].mxu0 }
 0x152   : > { %v716_v0 = vpop.f32.mrb[2].mxu1  ;;  %v680_v1 = vadd.f32 %v679_v63, %v678_v62  ;;  %v442_v3 = vadd.f32 %v715_v60, %v367_v61 }
 0x153   : > { %v717_v2 = vpop.f32.mrb[3].mxu1 }
 0x154   : > { %v718_v4 = vadd.f32 %v717_v2, %v716_v0  ;;  %v372_v5 = vadd.f32 %v680_v1, %v634_v55 }
 0x156   : > { %v447_v6 = vadd.f32 %v718_v4, %v372_v5 }
 0x15c   : > { %v747_v7 = vpop.f32.mrb[4].mxu0 }
 0x15d   : > { %v522_v8 = vadd.f32 %v747_v7, %v447_v6  ;;  %v516_v9 = vpop.f32.mrb[5].mxu0 }
 0x15e   : > { %v517_v10 = vadd.f32 %v516_v9, %v442_v3 }
 0x15f   : > { %v526_v11 = vmax.f32 %v522_v8, 0.0 }
 0x160   : > { %v525_v12 = vmax.f32 %v517_v10, 0.0 }
 0x161   : > { %528 = vst [vmem:[%s203_s22 + $0x8] sm:$0xff] %v526_v11 }
 0x162   : > { %527 = vst [vmem:[%s203_s22] sm:$0xff] %v525_v12 }
 0x163   : > { %965 = shalt.err (!%p962_p7)
}
 0x164   : > { %s966_s25 = scalar_lea.hbm %s1226_s27, 256  ;;  %s970_s9 = scalar_lea.hbm %s1273_s3, 512 }
 0x165   : > { %p967_p9 = scmp.ne.s32.totalorder %s1226_s27, %s966_s25  ;;  %p971_p5 = scmp.lt.u32.totalorder %s1226_s27, %s1273_s3 }
 0x166   : > { %p972_p11 = scmp.lt.u32.totalorder %s970_s9, %s966_s25  ;;  %p974_p4 = scmp.lt.u32.totalorder %s966_s25, %s1226_s27 }
 0x167   : > { %p968_p2 = pnand %p967_p9, %p1144_p12 }
 0x168   : > { %p973_p1 = por %p972_p11, %p971_p5 }
 0x169   : > { %p969_p0 = pneg %p968_p2 }
 0x16a   : > { %p975_p6 = por %p974_p4, %p973_p1 }
 0x16c   : > { %p976_p8 = pnand %p975_p6, %p969_p0 }
 0x16e   : > { %979 = shalt.err (!%p976_p8)
}
 0x16f   : > { %s1031_s4 = smov 128   ;;  %s1032_s22 = smov 8  }
 0x170   : > { %837 = dma.vmem_to_hbm [thread:$0]  (%p1144_p12), %s1221_s26, 256, %s1226_s27, %s530_s28, %s1031_s4, %s1031_s4, %s1032_s22  }
 0x171 PF: > { %s558_s5 = sand.u32 1, %s1010_s12   ;;  %p1288_p10 = scmp.ne.s32.totalorder %s1278_s19, 0 }
 0x172   : > { %p1289_p13 = scmp.ge.s32.totalorder %s1022_s15, 2  ;;  %s559_s10 = scalar_lea.sflag [#allocation4], %s558_s5 }
 0x174   : > { %p848_p3 = pnand %p1289_p13, %p1288_p10 }
 0x176   : > { %1005 = dma.done.wait (!%p848_p3), %s559_s10, 256  }
 0x177   : > { %1007 = vsyncadd (!%p848_p3), %s559_s10, 4294967040  ;;  %p17_p7 = scmp.ge.s32.totalorder %s1109_s24, 4   ;;  %s1290_s12 = smov %s1014_s13 }
 0x178   : > { %s1291_s13 = smov %s1018_s14  ;;  %s1292_s14 = smov %s1140_s17 }
 0x179   : > { %s1293_s15 = smov %s1109_s24  ;;  %19 = sbr.rel (!%p17_p7) target bundleno = 6 (0x6), region = 81 }
 0x180   :  { %564 = vsyncpa [#allocation3], 1 }
 0x181   :  { %566 = vsyncpa [#allocation3 + $0x1], 1 }
 0x182   :  { %567 = vsyncpa [#allocation6], 1 }
 0x183   :  { %568 = vsyncpa [#allocation4], 1 }
 0x184   :  { %570 = vsyncpa [#allocation4 + $0x1], 1 }

</bundles_post_ra>
